<compile_context>
chip_gen: v5e
topology: v5e:2x2
jax: 0.10.0
libtpu: 0.0.40
codegen_flags: <defaults>
</compile_context>

<pallas_src>
import jax
import jax.numpy as jnp
from jax.experimental import pallas as pl
from jax.experimental.pallas import tpu as pltpu


def content_attention_kernel(inp_ref, ctx_ref, w_in_t_ref, w_wc_t_ref,
                             w_xin_t_ref, out_ref, attn_ref):
    x = inp_ref[...]            # (TB, D)
    ctx = ctx_ref[...]          # (TB, L, D)
    w_in_t = w_in_t_ref[...]    # (D, D)  == W_in.T          (pre-transposed)
    w_wc_t = w_wc_t_ref[...]    # (D, D)  == W_out[:, :D].T  (pre-transposed)
    w_xin_t = w_xin_t_ref[...]  # (D, D)  == W_out[:, D:].T  (pre-transposed)

    # targetT = linear_in(input): (TB, D) @ (D, D) on the MXU, f32 accumulate.
    t = jnp.dot(x, w_in_t, preferred_element_type=jnp.float32)

    # attn logits = bmm(context, targetT): batched MXU matmul contracting D.
    # (TB, 1, D) x (TB, L, D) -> (TB, 1, L) -> (TB, L)
    logits = jnp.einsum('bqd,bld->bql', t[:, None, :], ctx,
                        preferred_element_type=jnp.float32)[:, 0, :]

    # softmax over the source-length axis (PyTorch softmax dim=1 on 2-D).
    m = jnp.max(logits, axis=-1, keepdims=True)
    e = jnp.exp(logits - m)
    denom = jnp.sum(e, axis=-1, keepdims=True)
    attn = e * pl.reciprocal(denom, approx=False)   # exact: keep 1e-5 tolerance

    # weighted_context = bmm(attn, context): batched MXU matmul contracting L.
    # (TB, 1, L) x (TB, L, D) -> (TB, 1, D) -> (TB, D)
    weighted = jnp.einsum('bql,bld->bqd', attn[:, None, :], ctx,
                          preferred_element_type=jnp.float32)[:, 0, :]

    # tanh(linear_out(cat([weighted, input], 1))) without a lane-axis concat:
    # split W_out column-wise so the concat becomes a sum of two matmuls.
    out = jnp.tanh(
        jnp.dot(weighted, w_wc_t, preferred_element_type=jnp.float32)
        + jnp.dot(x, w_xin_t, preferred_element_type=jnp.float32))

    out_ref[...] = out.astype(out_ref.dtype)
    attn_ref[...] = attn.astype(attn_ref.dtype)


def content_attention(inp, ctx, w_in, w_out, *, tb=None):
    """inp: (B, D), ctx: (B, L, D), w_in: (D, D), w_out: (D, 2D)."""
    B, D = inp.shape
    _, L, _ = ctx.shape

    # Pre-transpose weights host-side (once) -> no in-kernel relayout.
    w_in_t = jnp.transpose(w_in)           # (D, D)
    w_wc_t = jnp.transpose(w_out[:, :D])   # (D, D) acts on weighted_context
    w_xin_t = jnp.transpose(w_out[:, D:])  # (D, D) acts on the original input

    # Batch-tile size: largest tile whose double-buffered streams fit a
    # conservative VMEM budget (v7x has only 64 MiB physical VMEM per TC).
    if tb is None:
        per_row_bytes = 2 * 4 * (L * D + 2 * D + L)   # double-buffered, f32
        budget = 40 * 1024 * 1024
        tb = max(1, min(B, budget // max(per_row_bytes, 1)))
    if tb < B:
        tb = max(8, (tb // 8) * 8)   # keep the sublane axis (8)-aligned
    else:
        tb = B
    grid = (pl.cdiv(B, tb),)

    tile_bytes = 4 * (tb * (L * D + 2 * D + L) + 3 * D * D)
    vmem_limit = int(min(64 * 1024 * 1024,
                         max(32 * 1024 * 1024, 4 * tile_bytes)))

    out, attn = pl.pallas_call(
        content_attention_kernel,
        out_shape=(
            jax.ShapeDtypeStruct((B, D), jnp.float32),
            jax.ShapeDtypeStruct((B, L), jnp.float32),
        ),
        grid_spec=pltpu.PrefetchScalarGridSpec(
            num_scalar_prefetch=0,
            grid=grid,
            in_specs=[
                pl.BlockSpec((tb, D), lambda i: (i, 0)),        # input
                pl.BlockSpec((tb, L, D), lambda i: (i, 0, 0)),  # context
                pl.BlockSpec((D, D), lambda i: (0, 0)),         # W_in.T
                pl.BlockSpec((D, D), lambda i: (0, 0)),         # W_out[:, :D].T
                pl.BlockSpec((D, D), lambda i: (0, 0)),         # W_out[:, D:].T
            ],
            out_specs=(
                pl.BlockSpec((tb, D), lambda i: (i, 0)),        # out
                pl.BlockSpec((tb, L), lambda i: (i, 0)),        # attn
            ),
        ),
        compiler_params=pltpu.CompilerParams(
            dimension_semantics=("parallel",),
            vmem_limit_bytes=vmem_limit,
        ),
    )(inp, ctx, w_in_t, w_wc_t, w_xin_t)
    return out, attn


def reference(inp, ctx, w_in, w_out):
    t = inp @ w_in.T
    logits = jnp.einsum("bld,bd->bl", ctx, t)
    attn = jax.nn.softmax(logits, axis=-1)
    weighted = jnp.einsum("bl,bld->bd", attn, ctx)
    combined = jnp.concatenate([weighted, inp], axis=1)
    return jnp.tanh(combined @ w_out.T), attn


if __name__ == "__main__":
    B, L, D = 2, 8, 32
    key = jax.random.PRNGKey(0)
    k1, k2, k3, k4 = jax.random.split(key, 4)

    inp = jax.random.normal(k1, (B, D), jnp.float32)
    ctx = jax.random.normal(k2, (B, L, D), jnp.float32)

    # deterministic parameter init (PyTorch Linear-style uniform bounds)
    bound_in = 1.0 / (D ** 0.5)
    bound_out = 1.0 / ((2 * D) ** 0.5)
    w_in = jax.random.uniform(k3, (D, D), jnp.float32, -bound_in, bound_in)
    w_out = jax.random.uniform(k4, (D, 2 * D), jnp.float32, -bound_out, bound_out)

    out, attn = content_attention(inp, ctx, w_in, w_out)
    jax.block_until_ready((out, attn))

    out_ref, attn_ref = reference(inp, ctx, w_in, w_out)
    assert jnp.allclose(out, out_ref, atol=1e-5, rtol=1e-5)
    assert jnp.allclose(attn, attn_ref, atol=1e-5, rtol=1e-5)
    print("KERNEL_OK")
</pallas_src>

<mosaic_0001>
module attributes {stable_mosaic.version = 11 : i64} {
  func.func @content_attention_kernel(%arg0: i32, %arg1: memref<2x32xf32, #tpu.memory_space<vmem>>, %arg2: memref<2x8x32xf32, #tpu.memory_space<vmem>>, %arg3: memref<32x32xf32, #tpu.memory_space<vmem>>, %arg4: memref<32x32xf32, #tpu.memory_space<vmem>>, %arg5: memref<32x32xf32, #tpu.memory_space<vmem>>, %arg6: memref<2x32xf32, #tpu.memory_space<vmem>>, %arg7: memref<2x8xf32, #tpu.memory_space<vmem>>) attributes {dimension_semantics = [#tpu.dimension_semantics<parallel>], iteration_bounds = array<i64: 1>, scalar_prefetch = 0 : i64, scratch_operands = 0 : i64, tpu.core_type = #tpu.core_type<tc>, window_params = [{transform_indices = @transform_0, window_bounds = array<i64: 2, 32>}, {transform_indices = @transform_1, window_bounds = array<i64: 2, 8, 32>}, {pipeline_mode = #tpu.pipeline_mode<synchronous>, transform_indices = @transform_2, window_bounds = array<i64: 32, 32>}, {pipeline_mode = #tpu.pipeline_mode<synchronous>, transform_indices = @transform_3, window_bounds = array<i64: 32, 32>}, {pipeline_mode = #tpu.pipeline_mode<synchronous>, transform_indices = @transform_4, window_bounds = array<i64: 32, 32>}, {transform_indices = @transform_5, window_bounds = array<i64: 2, 32>}, {transform_indices = @transform_6, window_bounds = array<i64: 2, 8>}]} {
    %c0 = arith.constant 0 : index
    %c0_0 = arith.constant 0 : index
    %0 = vector.load %arg1[%c0, %c0_0] : memref<2x32xf32, #tpu.memory_space<vmem>>, vector<2x32xf32>
    %c0_1 = arith.constant 0 : index
    %c0_2 = arith.constant 0 : index
    %c0_3 = arith.constant 0 : index
    %1 = vector.load %arg2[%c0_1, %c0_2, %c0_3] : memref<2x8x32xf32, #tpu.memory_space<vmem>>, vector<2x8x32xf32>
    %c0_4 = arith.constant 0 : index
    %c0_5 = arith.constant 0 : index
    %2 = vector.load %arg3[%c0_4, %c0_5] : memref<32x32xf32, #tpu.memory_space<vmem>>, vector<32x32xf32>
    %c0_6 = arith.constant 0 : index
    %c0_7 = arith.constant 0 : index
    %3 = vector.load %arg4[%c0_6, %c0_7] : memref<32x32xf32, #tpu.memory_space<vmem>>, vector<32x32xf32>
    %c0_8 = arith.constant 0 : index
    %c0_9 = arith.constant 0 : index
    %4 = vector.load %arg5[%c0_8, %c0_9] : memref<32x32xf32, #tpu.memory_space<vmem>>, vector<32x32xf32>
    %cst = arith.constant dense<0.000000e+00> : vector<2x32xf32>
    %5 = tpu.matmul %0, %2, %cst {dimension_numbers = #tpu.dot_dimension_numbers<[1], [0], [0], [1], [0, 0, 1, 1], [], []>} : vector<2x32xf32>, vector<32x32xf32>, vector<2x32xf32> -> vector<2x32xf32>
    %6 = vector.shape_cast %5 : vector<2x32xf32> to vector<2x1x32xf32>
    "tpu.trace_start"() <{level = 10 : i32, message = "bqd,bld->bql"}> : () -> ()
    %cst_10 = arith.constant dense<0.000000e+00> : vector<2x1x8xf32>
    %7 = tpu.matmul %6, %1, %cst_10 {dimension_numbers = #tpu.dot_dimension_numbers<[2], [2], [1], [1], [0, 0, 0, 1, 1, 1], [0], [0]>} : vector<2x1x32xf32>, vector<2x8x32xf32>, vector<2x1x8xf32> -> vector<2x1x8xf32>
    "tpu.trace_stop"() : () -> ()
    %8 = vector.shape_cast %7 : vector<2x1x8xf32> to vector<2x8xf32>
    %cst_11 = arith.constant dense<0xFF800000> : vector<2xf32>
    %9 = vector.multi_reduction <maximumf>, %8, %cst_11 [1] : vector<2x8xf32> to vector<2xf32>
    %10 = vector.shape_cast %9 : vector<2xf32> to vector<2x1xf32>
    %11 = vector.broadcast %10 : vector<2x1xf32> to vector<2x8xf32>
    %12 = arith.subf %8, %11 : vector<2x8xf32>
    %13 = math.exp %12 : vector<2x8xf32>
    %cst_12 = arith.constant dense<0.000000e+00> : vector<2xf32>
    %14 = vector.multi_reduction <add>, %13, %cst_12 [1] : vector<2x8xf32> to vector<2xf32>
    %15 = vector.shape_cast %14 : vector<2xf32> to vector<2x1xf32>
    %16 = tpu.reciprocal %15 : vector<2x1xf32> -> vector<2x1xf32>
    %17 = vector.broadcast %16 : vector<2x1xf32> to vector<2x8xf32>
    %18 = arith.mulf %13, %17 : vector<2x8xf32>
    %19 = vector.shape_cast %18 : vector<2x8xf32> to vector<2x1x8xf32>
    "tpu.trace_start"() <{level = 10 : i32, message = "bql,bld->bqd"}> : () -> ()
    %cst_13 = arith.constant dense<0.000000e+00> : vector<2x1x32xf32>
    %20 = tpu.matmul %19, %1, %cst_13 {dimension_numbers = #tpu.dot_dimension_numbers<[2], [1], [1], [2], [0, 0, 0, 1, 1, 2], [0], [0]>} : vector<2x1x8xf32>, vector<2x8x32xf32>, vector<2x1x32xf32> -> vector<2x1x32xf32>
    "tpu.trace_stop"() : () -> ()
    %21 = vector.shape_cast %20 : vector<2x1x32xf32> to vector<2x32xf32>
    %cst_14 = arith.constant dense<0.000000e+00> : vector<2x32xf32>
    %22 = tpu.matmul %21, %3, %cst_14 {dimension_numbers = #tpu.dot_dimension_numbers<[1], [0], [0], [1], [0, 0, 1, 1], [], []>} : vector<2x32xf32>, vector<32x32xf32>, vector<2x32xf32> -> vector<2x32xf32>
    %cst_15 = arith.constant dense<0.000000e+00> : vector<2x32xf32>
    %23 = tpu.matmul %0, %4, %cst_15 {dimension_numbers = #tpu.dot_dimension_numbers<[1], [0], [0], [1], [0, 0, 1, 1], [], []>} : vector<2x32xf32>, vector<32x32xf32>, vector<2x32xf32> -> vector<2x32xf32>
    %24 = arith.addf %22, %23 : vector<2x32xf32>
    %25 = math.tanh %24 : vector<2x32xf32>
    %c0_16 = arith.constant 0 : index
    %c0_17 = arith.constant 0 : index
    %26 = vector.load %arg6[%c0_16, %c0_17] : memref<2x32xf32, #tpu.memory_space<vmem>>, vector<2x32xf32>
    tpu.vector_store %arg6[%c0_16, %c0_17], %25 {strides = array<i32>} : memref<2x32xf32, #tpu.memory_space<vmem>>, vector<2x32xf32>,
    %c0_18 = arith.constant 0 : index
    %c0_19 = arith.constant 0 : index
    %27 = vector.load %arg7[%c0_18, %c0_19] : memref<2x8xf32, #tpu.memory_space<vmem>>, vector<2x8xf32>
    tpu.vector_store %arg7[%c0_18, %c0_19], %18 {strides = array<i32>} : memref<2x8xf32, #tpu.memory_space<vmem>>, vector<2x8xf32>,
    return
  }
  func.func @transform_0(%arg0: i32) -> (i32, i32) {
    %c0_i32 = arith.constant 0 : i32
    %c0_i32_0 = arith.constant 0 : i32
    return %arg0, %c0_i32 : i32, i32
  }
  func.func @transform_1(%arg0: i32) -> (i32, i32, i32) {
    %c0_i32 = arith.constant 0 : i32
    %c0_i32_0 = arith.constant 0 : i32
    %c0_i32_1 = arith.constant 0 : i32
    return %arg0, %c0_i32, %c0_i32_0 : i32, i32, i32
  }
  func.func @transform_2(%arg0: i32) -> (i32, i32) {
    %c0_i32 = arith.constant 0 : i32
    %c0_i32_0 = arith.constant 0 : i32
    %c0_i32_1 = arith.constant 0 : i32
    return %c0_i32, %c0_i32_0 : i32, i32
  }
  func.func @transform_3(%arg0: i32) -> (i32, i32) {
    %c0_i32 = arith.constant 0 : i32
    %c0_i32_0 = arith.constant 0 : i32
    %c0_i32_1 = arith.constant 0 : i32
    return %c0_i32, %c0_i32_0 : i32, i32
  }
  func.func @transform_4(%arg0: i32) -> (i32, i32) {
    %c0_i32 = arith.constant 0 : i32
    %c0_i32_0 = arith.constant 0 : i32
    %c0_i32_1 = arith.constant 0 : i32
    return %c0_i32, %c0_i32_0 : i32, i32
  }
  func.func @transform_5(%arg0: i32) -> (i32, i32) {
    %c0_i32 = arith.constant 0 : i32
    %c0_i32_0 = arith.constant 0 : i32
    return %arg0, %c0_i32 : i32, i32
  }
  func.func @transform_6(%arg0: i32) -> (i32, i32) {
    %c0_i32 = arith.constant 0 : i32
    %c0_i32_0 = arith.constant 0 : i32
    return %arg0, %c0_i32 : i32, i32
  }
}

</mosaic_0001>

<bundles_post_ra>
// kernel: tpu_custom_call.1
= control target key start
LH: loop header
LB: loop body
LE: loop exit
PB: predicated region body
PF: predicated region fallthrough
CT: control target
= control target key end

     0   :  { %12 = vsyncpa [#allocation3], 0  ;;  %s661_s0 = inlined_call_operand.hbm [shape: f32[2,32], index: 0, kind: input, shape index: {}]   ;;  %s662_s1 = inlined_call_operand.hbm [shape: f32[2,8,32], index: 1, kind: input, shape index: {}]   ;;  %s663_s2 = inlined_call_operand.hbm [shape: f32[32,32], index: 2, kind: input, shape index: {}]   ;;  %s664_s3 = inlined_call_operand.hbm [shape: f32[32,32], index: 3, kind: input, shape index: {}]   ;;  %s665_s4 = inlined_call_operand.hbm [shape: f32[32,32], index: 4, kind: input, shape index: {}]   ;;  %s666_s5 = inlined_call_operand.hbm [shape: f32[2,32], index: 5, kind: output, shape index: {0}]   ;;  %s667_s6 = inlined_call_operand.hbm [shape: f32[2,8], index: 6, kind: output, shape index: {1}]  }
   0x1   :  { %13 = vsyncpa [#allocation6], 0 }
   0x2   :  { %14 = vsyncpa [#allocation9], 0 }
   0x3   :  { %15 = vsyncpa [#allocation4], 0  ;;  %s32_s23 = sshll.u32 %s662_s1, 4  ;;  %s33_s23 = int_to_ptr.hbm [resolvable:$true] %s32_s23 }
   0x4   :  { %16 = vsyncpa [#allocation13], 0  ;;  %s578_s24 = smov [#allocation5]   ;;  %s58_s28 = sshll.u32 %s664_s3, 4  ;;  %s59_s28 = int_to_ptr.hbm [resolvable:$true] %s58_s28 }
   0x5   :  { %s34_s25 = sshll.u32 %s578_s24, 4  ;;  %s579_s29 = smov 128   ;;  %s35_s25 = int_to_ptr.vmem [resolvable:$true] %s34_s25 }
   0x6   :  { %s580_s30 = smov 8   ;;  %s581_s7 = smov [#allocation8]  }
   0x7   :  { %40 = dma.hbm_to_vmem [thread:$0]  %s33_s23, 256, %s35_s25, [#allocation6], %s579_s29, %s579_s29, %s580_s30  }
   0x8   :  { %s60_s8 = sshll.u32 %s581_s7, 4  ;;  %s22_s11 = sshll.u32 %s661_s0, 4  ;;  %s61_s8 = int_to_ptr.vmem [resolvable:$true] %s60_s8  ;;  %s23_s11 = int_to_ptr.hbm [resolvable:$true] %s22_s11 }
   0x9   :  { %66 = dma.hbm_to_vmem [thread:$0]  %s59_s28, 512, %s61_s8, [#allocation9], %s579_s29, %s579_s29, %s580_s30  }
   0xa   :  { %s45_s13 = sshll.u32 %s663_s2, 4  ;;  %s582_s14 = smov [#allocation2]   ;;  %s46_s13 = int_to_ptr.hbm [resolvable:$true] %s45_s13 }
   0xb   :  { %s24_s15 = sshll.u32 %s582_s14, 4  ;;  %s583_s3 = smov [#allocation7]   ;;  %s25_s15 = int_to_ptr.vmem [resolvable:$true] %s24_s15 }
   0xc   :  { %27 = dma.hbm_to_vmem [thread:$0]  %s23_s11, 32, %s25_s15, [#allocation3]  }
   0xd   :  { %s47_s16 = sshll.u32 %s583_s3, 4  ;;  %s71_s19 = sshll.u32 %s665_s4, 4  ;;  %s48_s16 = int_to_ptr.vmem [resolvable:$true] %s47_s16  ;;  %s72_s19 = int_to_ptr.hbm [resolvable:$true] %s71_s19 }
   0xe   :  { %53 = dma.hbm_to_vmem [thread:$0]  %s46_s13, 512, %s48_s16, [#allocation6], %s579_s29, %s579_s29, %s580_s30  }
   0xf   :  { %s584_s0 = smov [#allocation10]  }
  0x10   :  { %s73_s20 = sshll.u32 %s584_s0, 4  ;;  %s74_s20 = int_to_ptr.vmem [resolvable:$true] %s73_s20 }
  0x11   :  { %79 = dma.hbm_to_vmem [thread:$0]  %s72_s19, 512, %s74_s20, [#allocation9], %s579_s29, %s579_s29, %s580_s30  }
  0x12   :  { %568 = dma.done.wait [#allocation3], 32  }
  0x13   :  { %569 = vsyncadd [#allocation3], 4294967264 }
  0x14   :  { %570 = dma.done.wait [#allocation6], 768  }
  0x15   :  { %571 = vsyncadd [#allocation6], 4294966528 }
  0x16   :  { %572 = dma.done.wait [#allocation9], 1024  }
  0x17   :  { %573 = vsyncadd [#allocation9], 4294966272  ;;  %v106_v0 = vld [vmem:[#allocation7 + $0x18] sm:$0xff]  ;;  %v105_v1 = vld [vmem:[#allocation7 + $0x10] sm:$0xff]  ;;  %vm115_vm0 = vcmask 261120   ;;  %vm194_vm1 = vcmask 1041409  }
  0x18   :  { %131 = vmatpush.msra.mxu0 %v106_v0  ;;  %v101_v2 = vld [vmem:[#allocation5] sm:$0xff]  ;;  %v104_v3 = vld [vmem:[#allocation7 + $0x8] sm:$0xff]  ;;  %v103_v4 = vld [vmem:[#allocation7] sm:$0xff]  ;;  %vm197_vm2 = vcmask 58368   ;;  %vm239_vm7 = vcmask 64512   ;;  %s585_s2 = smov [#allocation12]  }
  0x19   :  { %375 = vmatpush.xpose.msk.msra.mxu1 %vm115_vm0, %v101_v2  ;;  %258 = vmatpush.msra.mxu3 %v101_v2  ;;  %v638_v5 = vld [vmem:[#allocation2] sm:$0x3]  ;;  %v102_v6 = vld [vmem:[#allocation5 + $0x8] sm:$0xff]  ;;  %v109_v42 = vld [vmem:[#allocation8 + $0x10] sm:$0xff]  ;;  %s355_s4 = sshll.u32 %s585_s2, 4  ;;  %s357_s23 = sshll.u32 %s667_s6, 4  ;;  %s356_s4 = int_to_ptr.vmem [resolvable:$true] %s355_s4  ;;  %s358_s23 = int_to_ptr.hbm [resolvable:$true] %s357_s23 }
  0x1a   :  { %132 = vmatpush.msra.mxu0 %v105_v1  ;;  %377 = vmatpush.xpose.msk.msra.mxu2 %vm115_vm0, %v102_v6  ;;  %v110_v41 = vld [vmem:[#allocation8 + $0x18] sm:$0xff]  ;;  %v108_v43 = vld [vmem:[#allocation8 + $0x8] sm:$0xff]  ;;  %v107_v45 = vld [vmem:[#allocation8] sm:$0xff]  ;;  %s586_s24 = smov [#allocation11]   ;;  %s346_s28 = sshll.u32 %s666_s5, 4  ;;  %vm333_vm8 = vcmask 254976   ;;  %s347_s28 = int_to_ptr.hbm [resolvable:$true] %s346_s28 }
  0x1b   :  { %281 = vmatpush.msrb.mxu3 %v102_v6  ;;  %v114_v44 = vld [vmem:[#allocation10 + $0x18] sm:$0xff]  ;;  %v113_v46 = vld [vmem:[#allocation10 + $0x10] sm:$0xff]  ;;  %v112_v47 = vld [vmem:[#allocation10 + $0x8] sm:$0xff]  ;;  %s344_s25 = sshll.u32 %s586_s24, 4  ;;  %s345_s25 = int_to_ptr.vmem [resolvable:$true] %s344_s25 }
  0x1c   :  { %133 = vmatpush.msra.mxu0 %v104_v3  ;;  %v111_v48 = vld [vmem:[#allocation10] sm:$0xff] }
  0x1d   :  { %298 = vmatpush.msrb.mxu1 %v114_v44 }
  0x1e   :  { %134 = vmatpush.msra.mxu0 %v103_v4  ;;  %324 = vmatpush.msrb.mxu2 %v110_v41 }
  0x1f   :  { %374 = vmatmul.msk.f32.vlgmr.msra.gmra.mxu0 %vm115_vm0, %v638_v5  ;;  %299 = vmatpush.msrb.mxu1 %v113_v46 }
  0x20   :  { %325 = vmatpush.msrb.mxu2 %v109_v42 }
  0x21   :  { %300 = vmatpush.msrb.mxu1 %v112_v47 }
  0x22   :  { %326 = vmatpush.msrb.mxu2 %v108_v43 }
  0x23   :  { %301 = vmatpush.msrb.mxu1 %v111_v48 }
  0x24   :  { %327 = vmatpush.msrb.mxu2 %v107_v45 }
  0x9c   :  { %v136_v7 = vpop.f32.mrf.mxu0 }
  0x9d   :  { %v140_v8 = vrot.slane %v136_v7, 1  ;;  %376 = vmatmul.msk.f32.vlgmr.msra.gmra.mxu1 %vm115_vm0, %v136_v7 }
  0x9f   :  { %378 = vmatmul.msk.f32.vlgmr.msra.gmra.mxu2 %vm115_vm0, %v140_v8 }
  0xa5   :  { %381 = vmatmul.msk.f32.vlgmr.msrb.gmra.mxu1 %vm115_vm0, %v638_v5 }
 0x11a   :  { %v163_v11 = vpop.f32.mrf.mxu1 }
 0x122   :  { %v188_v9 = vpop.f32.mrf.mxu2  ;;  %v303_v53 = vpop.f32.mrf.mxu1 }
 0x123   :  { %v193_v10 = vrot.slane %v188_v9, 7 }
 0x125   :  { %v195_v12 = vsel %vm194_vm1, %v193_v10, %v163_v11 }
 0x126   :  { %v198_v13 = vsel %vm197_vm2, %v195_v12, -inf }
 0x127   :  { %199 = vmax.xlane.f32.xlu0 %v198_v13 }
 0x19a   :  { %v200_v14 = vpop.xlane.xlu0 %199 }
 0x19b   :  { %v202_v15 = vrot.slane %v200_v14, 1  ;;  %v205_v16 = vsub.f32 %v163_v11, %v200_v14 }
 0x19d   :  { %v206_v17 = vsub.f32 %v188_v9, %v202_v15  ;;  %v207_v18 = vmul.f32 1.442695, %v205_v16 }
 0x19f   :  { %v209_v19 = vmul.f32 1.442695, %v206_v17 }
 0x1a1   :  { %392 = vpow2.f32 %v209_v19 }
 0x1a2   :  { %394 = vpow2.f32 %v207_v18 }
 0x1a7   :  { %v393_v20 = vpop.eup %392 }
 0x1a8   :  { %v213_v21 = vrot.slane %v393_v20, 7  ;;  %v395_v22 = vpop.eup %394 }
 0x1aa   :  { %v214_v23 = vsel %vm194_vm1, %v213_v21, %v395_v22 }
 0x1ab   :  { %v216_v24 = vsel %vm197_vm2, %v214_v23, 0.0 }
 0x1ac   :  { %217 = vadd.xlane.f32.xlu0 %v216_v24 }
 0x21f   :  { %v218_v25 = vpop.xlane.xlu0 %217 }
 0x220   :  { %396 = vrcp.f32 %v218_v25  ;;  %v230_v29 = vand.u32 2147483648, %v218_v25  ;;  %v228_v31 = vand.u32 2147483647, %v218_v25  ;;  %vm224_vm4 = vweird.f32 %v218_v25 }
 0x222   :  { %v231_v33 = vor.u32 1.1754944e-38, %v230_v29  ;;  %vm229_vm6 = vcmp.eq.f32.partialorder %v228_v31, 8.507059e+37 }
 0x226   :  { %v397_v26 = vpop.eup %396 }
 0x227   :  { %v220_v27 = vmul.f32 %v397_v26, %v218_v25  ;;  %vm225_vm3 = vweird.f32 %v397_v26 }
 0x228   :  { %vm226_vm5 = vmor %vm224_vm4, %vm225_vm3 }
 0x229   :  { %v221_v28 = vsub.f32 1.0, %v220_v27 }
 0x22b   :  { %v222_v30 = vmul.f32 %v397_v26, %v221_v28 }
 0x22d   :  { %v223_v32 = vadd.f32 %v397_v26, %v222_v30 }
 0x22f   :  { %v227_v34 = vsel %vm226_vm5, %v397_v26, %v223_v32 }
 0x230   :  { %v232_v35 = vsel %vm229_vm6, %v231_v33, %v227_v34 }
 0x231   :  { %v234_v36 = vrot.slane %v232_v35, 1  ;;  %v237_v37 = vmul.f32 %v395_v22, %v232_v35 }
 0x233   :  { %379 = vmatmul.msk.f32.vlgmr.msra.gmra.mxu3 %vm239_vm7, %v237_v37  ;;  %v238_v38 = vmul.f32 %v393_v20, %v234_v36 }
 0x235   :  { %v335_v39 = vrot.slane %v238_v38, 7 }
 0x237   :  { %v336_v40 = vsel %vm194_vm1, %v335_v39, %v237_v37 }
 0x238   :  { %338 = vst.msk [vmem:[#allocation12] sm:$0x3] %vm197_vm2, %v336_v40 }
 0x239   :  { %360 = dma.vmem_to_hbm [thread:$0]  %s356_s4, 32, %s358_s23, [#allocation13]  }
 0x23b   :  { %380 = vmatmul.msk.f32.vlgmr.msrb.gmra.mxu3 %vm239_vm7, %v238_v38 }
 0x2b6   :  { %v260_v49 = vpop.f32.mrf.mxu3 }
 0x2be   :  { %v283_v50 = vpop.f32.mrf.mxu3 }
 0x2bf   :  { %v308_v51 = vrot.slane %v283_v50, 7 }
 0x2c1   :  { %v309_v52 = vsel %vm194_vm1, %v308_v51, %v260_v49 }
 0x2c2   :  { %382 = vmatmul.msk.f32.vlgmr.msrb.gmra.mxu2 %vm115_vm0, %v309_v52 }
 0x345   :  { %v329_v54 = vpop.f32.mrf.mxu2 }
 0x346   :  { %v330_v55 = vadd.f32 %v329_v54, %v303_v53 }
 0x348   :  { %398 = vtanh.f32 %v330_v55 }
 0x34e   :  { %v399_v56 = vpop.eup %398 }
 0x34f   :  { %334 = vst.msk [vmem:[#allocation11] sm:$0x3] %vm333_vm8, %v399_v56 }
 0x350   :  { %349 = dma.vmem_to_hbm [thread:$0]  %s345_s25, 32, %s347_s28, [#allocation4]  }
 0x351   :  { %574 = dma.done.wait [#allocation4], 32  }
 0x352   :  { %575 = vsyncadd [#allocation4], 4294967264 }
 0x353   :  { %576 = dma.done.wait [#allocation13], 32  }
 0x354   :  { %577 = vsyncadd [#allocation13], 4294967264 }
 0x355   :  { %369 = vsyncpa [#allocation3], 1 }
 0x356   :  { %370 = vsyncpa [#allocation6], 1 }
 0x357   :  { %371 = vsyncpa [#allocation9], 1 }
 0x358   :  { %372 = vsyncpa [#allocation4], 1 }
 0x359   :  { %373 = vsyncpa [#allocation13], 1 }

</bundles_post_ra>
